<compile_context>
chip_gen: v7x
topology: tpu7x:2x2x1
jax: 0.10.0
libtpu: 0.0.40
codegen_flags: <defaults>
</compile_context>

<pallas_src>
import functools

import numpy as np
import jax
import jax.numpy as jnp
from jax import lax
from jax.experimental import pallas as pl
from jax.experimental.pallas import tpu as pltpu

DIM = 2          # limit cycle lives in 2-D polar coordinates (r, theta)
PACK = 8         # packed sublane channels: [r, theta, v00, v01, v10, v11, 0, 0]
LANE_TILE = 128  # minimum lane tile (batch axis)
MAX_TILE = 2048  # largest single lane tile (VMEM cost is a few KiB, no cap needed)


def _pow_static(a, n):
    """a ** n for a static python int n >= 0 (squaring at trace time)."""
    result = jnp.ones_like(a)
    base = a
    n = int(n)
    while n > 0:
        if n & 1:
            result = result * base
        base = base * base
        n >>= 1
    return result


def _rollout_kernel(a_ref, b_ref, z_ref, o_ref, *, T, tb, emit_cartesian,
                    closed_form):
    """T-step affine propagation of the packed limit-cycle state.

    a_ref : VMEM (PACK, 1)   per-sublane multiplicative coefficient A
    b_ref : VMEM (PACK, 1)   per-sublane additive coefficient Bc
    z_ref : VMEM (PACK, tb)  packed state [r, th, v00, v01, v10, v11, 0, 0] x batch
    o_ref : VMEM (PACK, tb)  packed state after T steps (rows 0,1 optionally
                             converted to cartesian when emit_cartesian)
    """
    x0 = z_ref[...]                                        # (PACK, tb) full-tile load

    if closed_form:
        # x_T = A^T x_0 + Bc * sum_{k<T} A^k   (exact for the constant-Jacobian case)
        a = a_ref[...]                                     # (PACK, 1)
        b = b_ref[...]
        aT = _pow_static(a, T)
        one = jnp.ones_like(a)
        denom = one - a
        is_one = jnp.abs(denom) < 1e-6
        safe = jnp.where(is_one, one, denom)
        geo = jnp.where(is_one, jnp.full_like(a, float(T)), (one - aT) / safe)
        A_eff = jnp.broadcast_to(aT, (PACK, tb))
        B_eff = jnp.broadcast_to(b * geo, (PACK, tb))
        x = A_eff * x0 + B_eff
    else:
        # hoist + lane-broadcast coefficients ONCE (JAX does not CSE broadcast_in_dim)
        A = jnp.broadcast_to(a_ref[...], (PACK, tb))
        B = jnp.broadcast_to(b_ref[...], (PACK, tb))

        def step(_, x):
            return A * x + B                               # 2 full-vreg ops / step

        unroll = True if T <= 256 else 32
        x = lax.fori_loop(0, T, step, x0, unroll=unroll)

    if emit_cartesian:
        # fused polar -> cartesian epilogue (cos/sin ride the otherwise-idle EUP slot)
        r = x[0:1, :]
        th = x[1:2, :]
        x = jnp.concatenate([r * jnp.cos(th), r * jnp.sin(th), x[2:, :]], axis=0)

    o_ref[...] = x                                         # single full-tile store


def _pack_coeffs(r_des, gain, omega, dt, var_flat, reverse):
    """Per-sublane affine coefficients (A, Bc) for the packed recursion."""
    sign = -1.0 if reverse else 1.0
    sgdt = sign * gain * dt                   # sign * gain * dt
    a00 = 1.0 - sgdt                          # Ad[0,0] = sign * (-gain) * dt + 1
    q = jnp.asarray(var_flat, jnp.float32) * jnp.float32(dt)   # [q00,q01,q10,q11]*dt
    # rows:           r     th    v00        v01  v10  v11  pad  pad
    A = jnp.array([a00, 1.0, a00 * a00, a00, a00, 1.0, 0.0, 0.0], jnp.float32)
    B = jnp.concatenate([
        jnp.array([sgdt * r_des, sign * omega * dt], jnp.float32),
        q,
        jnp.zeros((2,), jnp.float32),
    ])
    return A.reshape(PACK, 1), B.reshape(PACK, 1)


def rollout(z0, A, B, *, T, emit_cartesian=False, closed_form=False, tb=None):
    """Run the Pallas rollout kernel.

    z0 : (batch, DIM) polar state;  A, B : (PACK, 1) per-sublane coefficients.
    returns packed result (PACK, batch) (rows [r|x, th|y, v00, v01, v10, v11, 0, 0]).
    """
    Bn = z0.shape[0]
    B_pad = max(LANE_TILE, ((Bn + LANE_TILE - 1) // LANE_TILE) * LANE_TILE)
    if tb is None:
        tb = min(MAX_TILE, B_pad)
        # TODO(synk): on v7x pick tb so the "parallel" grid has >=2 tiles for large
        # batches (2 TensorCores); one max-size tile is optimal on v5e/v6e.
    assert B_pad % tb == 0

    # lane-dense packed layout: 6 channels on sublanes, padded batch on lanes;
    # rows 2..7 zeroed = initial covariance -> initial carry is one full-tile load.
    z_pack = jnp.zeros((PACK, B_pad), jnp.float32)
    z_pack = z_pack.at[0:DIM, :Bn].set(z0.T.astype(jnp.float32))

    kernel = functools.partial(
        _rollout_kernel, T=int(T), tb=tb,
        emit_cartesian=emit_cartesian, closed_form=closed_form)

    out = pl.pallas_call(
        kernel,
        out_shape=jax.ShapeDtypeStruct((PACK, B_pad), jnp.float32),
        grid=(B_pad // tb,),
        in_specs=[
            pl.BlockSpec((PACK, 1), lambda i: (0, 0)),     # A coefficients
            pl.BlockSpec((PACK, 1), lambda i: (0, 0)),     # Bc coefficients
            pl.BlockSpec((PACK, tb), lambda i: (0, i)),    # packed state lane-tile
        ],
        out_specs=pl.BlockSpec((PACK, tb), lambda i: (0, i)),
        compiler_params=pltpu.CompilerParams(dimension_semantics=("parallel",)),
    )(A, B, z_pack)

    return out[:, :Bn]


class LimitCycleDynamicModelPallas:
    """JAX/Pallas port of LimitCycleDynamicModel (deterministic concrete instance)."""

    def __init__(self, dim=2, dt=0.01, r_des=1.0, gain=2.0, omega=3.0):
        assert dim == DIM
        self.dim = dim
        self.dt = float(dt)
        self.r_des = float(r_des)
        self.gain = float(gain)
        self.omega = float(omega)
        # process-noise covariance `self.var` (deterministic init)
        self.var = 0.01 * jnp.eye(dim, dtype=jnp.float32)

    def _coeffs(self, reverse):
        return _pack_coeffs(self.r_des, self.gain, self.omega, self.dt,
                            self.var.reshape(-1), reverse)

    # glue (plain JAX): cartesian <-> polar coordinate transform
    def transform(self, x, reverse=False):
        if not reverse:
            r = jnp.sqrt(x[:, 0:1] ** 2 + x[:, 1:2] ** 2)
            th = jnp.arctan2(x[:, 1:2], x[:, 0:1])
            return jnp.concatenate([r, th], axis=1)
        r, th = x[:, 0:1], x[:, 1:2]
        return jnp.concatenate([r * jnp.cos(th), r * jnp.sin(th)], axis=1)

    def evolve(self, x, T=1, reverse=False, noise=False, closed_form=False):
        # TODO(synk): noise=True (MultivariateNormal.rsample per step) not implemented.
        z0 = self.transform(x, reverse=False)          # cart -> polar (atan2, plain JAX)
        A, B = self._coeffs(reverse)
        out = rollout(z0, A, B, T=T, emit_cartesian=True, closed_form=closed_form)
        return out[0:DIM, :].T                          # polar->cart fused in-kernel

    def step_forward(self, x, noise=False):
        return self.evolve(x, T=1, reverse=False, noise=noise)

    def step_backwards(self, x, noise=False):
        return self.evolve(x, T=1, reverse=True, noise=noise)

    def conditional_distribution_stats(self, z0, T=1, reverse=False, closed_form=False):
        """Polar-space (mean, covariance) after T steps — core of conditional_distribution.
        Distribution-object construction (Normal / AngleNormal) is left to the caller."""
        A, B = self._coeffs(reverse)
        out = rollout(z0, A, B, T=T, emit_cartesian=False, closed_form=closed_form)
        mu = out[0:DIM, :].T                                     # (batch, DIM)
        var = out[DIM:DIM + DIM * DIM, :].T.reshape(-1, DIM, DIM)  # (batch, DIM, DIM)
        return mu, var


def _reference_rollout(z0, qn, r_des, gain, omega, dt, T, reverse=False):
    """Pure NumPy mirror of the torch loop for verification."""
    sign = -1.0 if reverse else 1.0
    mu = np.asarray(z0, np.float32).copy()
    var = np.zeros((mu.shape[0], DIM, DIM), np.float32)
    eye = np.eye(DIM, dtype=np.float32)
    qn = np.asarray(qn, np.float32)
    for _ in range(T):
        J = np.zeros((mu.shape[0], DIM, DIM), np.float32)
        J[:, 0, 0] = -gain
        Ad = sign * J * dt + eye
        vel = np.stack(
            [-gain * (mu[:, 0] - r_des), np.full(mu.shape[0], omega, np.float32)], axis=1
        )
        mu = sign * vel * dt + mu
        var = Ad @ var @ Ad + qn * dt
    return mu, var


if __name__ == "__main__":
    key = jax.random.PRNGKey(0)
    B, T = 8, 16
    # cartesian initial states (shifted so r > 0)
    x = jax.random.normal(key, (B, DIM), jnp.float32) + jnp.array([1.5, 0.0], jnp.float32)

    model = LimitCycleDynamicModelPallas(dim=DIM, dt=0.01)

    # evolve (cartesian, noise=False): T forward Euler steps, polar->cart fused in-kernel
    xT = model.evolve(x, T=T)

    # conditional_distribution core: polar mean + covariance propagation (fwd + bwd)
    z0 = model.transform(x)
    mu_f, var_f = model.conditional_distribution_stats(z0, T=T, reverse=False)
    mu_b, var_b = model.conditional_distribution_stats(z0, T=T, reverse=True)
    # flag-gated O(1) closed-form fast path (same semantics, constant Jacobian)
    mu_c, var_c = model.conditional_distribution_stats(z0, T=T, reverse=False,
                                                       closed_form=True)

    jax.block_until_ready((xT, mu_f, var_f, mu_b, var_b, mu_c, var_c))

    # verify against a pure-NumPy reference of the torch loop
    mu_ref, var_ref = _reference_rollout(
        np.asarray(z0), np.asarray(model.var), 1.0, 2.0, 3.0, 0.01, T, reverse=False
    )
    mu_ref_b, var_ref_b = _reference_rollout(
        np.asarray(z0), np.asarray(model.var), 1.0, 2.0, 3.0, 0.01, T, reverse=True
    )
    assert np.allclose(np.asarray(mu_f), mu_ref, atol=1e-5)
    assert np.allclose(np.asarray(var_f), var_ref, atol=1e-6)
    assert np.allclose(np.asarray(mu_b), mu_ref_b, atol=1e-5)
    assert np.allclose(np.asarray(var_b), var_ref_b, atol=1e-6)
    assert np.allclose(np.asarray(mu_c), mu_ref, atol=1e-4)
    assert np.allclose(np.asarray(var_c), var_ref, atol=1e-5)
    xT_ref = np.stack(
        [mu_ref[:, 0] * np.cos(mu_ref[:, 1]), mu_ref[:, 0] * np.sin(mu_ref[:, 1])], axis=1
    )
    assert np.allclose(np.asarray(xT), xT_ref, atol=1e-4)

    print("KERNEL_OK")
</pallas_src>

<mosaic_0001>
module attributes {stable_mosaic.version = 11 : i64} {
  func.func @_rollout_kernel(%arg0: i32, %arg1: memref<8x1xf32, #tpu.memory_space<vmem>>, %arg2: memref<8x1xf32, #tpu.memory_space<vmem>>, %arg3: memref<8x128xf32, #tpu.memory_space<vmem>>, %arg4: memref<8x128xf32, #tpu.memory_space<vmem>>) attributes {dimension_semantics = [#tpu.dimension_semantics<parallel>], iteration_bounds = array<i64: 1>, scalar_prefetch = 0 : i64, scratch_operands = 0 : i64, tpu.core_type = #tpu.core_type<tc>, window_params = [{pipeline_mode = #tpu.pipeline_mode<synchronous>, transform_indices = @transform_0, window_bounds = array<i64: 8, 1>}, {pipeline_mode = #tpu.pipeline_mode<synchronous>, transform_indices = @transform_1, window_bounds = array<i64: 8, 1>}, {transform_indices = @transform_2, window_bounds = array<i64: 8, 128>}, {transform_indices = @transform_3, window_bounds = array<i64: 8, 128>}]} {
    %c0 = arith.constant 0 : index
    %c0_0 = arith.constant 0 : index
    %0 = vector.load %arg3[%c0, %c0_0] : memref<8x128xf32, #tpu.memory_space<vmem>>, vector<8x128xf32>
    %c0_1 = arith.constant 0 : index
    %c0_2 = arith.constant 0 : index
    %1 = vector.load %arg1[%c0_1, %c0_2] : memref<8x1xf32, #tpu.memory_space<vmem>>, vector<8x1xf32>
    %2 = vector.shape_cast %1 : vector<8x1xf32> to vector<8x1xf32>
    %3 = vector.broadcast %2 : vector<8x1xf32> to vector<8x128xf32>
    %c0_3 = arith.constant 0 : index
    %c0_4 = arith.constant 0 : index
    %4 = vector.load %arg2[%c0_3, %c0_4] : memref<8x1xf32, #tpu.memory_space<vmem>>, vector<8x1xf32>
    %5 = vector.shape_cast %4 : vector<8x1xf32> to vector<8x1xf32>
    %6 = vector.broadcast %5 : vector<8x1xf32> to vector<8x128xf32>
    %c0_i32 = arith.constant 0 : i32
    %7 = arith.mulf %3, %0 : vector<8x128xf32>
    %8 = arith.addf %7, %6 : vector<8x128xf32>
    %c1_i32 = arith.constant 1 : i32
    %9 = arith.mulf %3, %8 : vector<8x128xf32>
    %10 = arith.addf %9, %6 : vector<8x128xf32>
    %c2_i32 = arith.constant 2 : i32
    %11 = arith.mulf %3, %10 : vector<8x128xf32>
    %12 = arith.addf %11, %6 : vector<8x128xf32>
    %c3_i32 = arith.constant 3 : i32
    %13 = arith.mulf %3, %12 : vector<8x128xf32>
    %14 = arith.addf %13, %6 : vector<8x128xf32>
    %c4_i32 = arith.constant 4 : i32
    %15 = arith.mulf %3, %14 : vector<8x128xf32>
    %16 = arith.addf %15, %6 : vector<8x128xf32>
    %c5_i32 = arith.constant 5 : i32
    %17 = arith.mulf %3, %16 : vector<8x128xf32>
    %18 = arith.addf %17, %6 : vector<8x128xf32>
    %c6_i32 = arith.constant 6 : i32
    %19 = arith.mulf %3, %18 : vector<8x128xf32>
    %20 = arith.addf %19, %6 : vector<8x128xf32>
    %c7_i32 = arith.constant 7 : i32
    %21 = arith.mulf %3, %20 : vector<8x128xf32>
    %22 = arith.addf %21, %6 : vector<8x128xf32>
    %c8_i32 = arith.constant 8 : i32
    %23 = arith.mulf %3, %22 : vector<8x128xf32>
    %24 = arith.addf %23, %6 : vector<8x128xf32>
    %c9_i32 = arith.constant 9 : i32
    %25 = arith.mulf %3, %24 : vector<8x128xf32>
    %26 = arith.addf %25, %6 : vector<8x128xf32>
    %c10_i32 = arith.constant 10 : i32
    %27 = arith.mulf %3, %26 : vector<8x128xf32>
    %28 = arith.addf %27, %6 : vector<8x128xf32>
    %c11_i32 = arith.constant 11 : i32
    %29 = arith.mulf %3, %28 : vector<8x128xf32>
    %30 = arith.addf %29, %6 : vector<8x128xf32>
    %c12_i32 = arith.constant 12 : i32
    %31 = arith.mulf %3, %30 : vector<8x128xf32>
    %32 = arith.addf %31, %6 : vector<8x128xf32>
    %c13_i32 = arith.constant 13 : i32
    %33 = arith.mulf %3, %32 : vector<8x128xf32>
    %34 = arith.addf %33, %6 : vector<8x128xf32>
    %c14_i32 = arith.constant 14 : i32
    %35 = arith.mulf %3, %34 : vector<8x128xf32>
    %36 = arith.addf %35, %6 : vector<8x128xf32>
    %c15_i32 = arith.constant 15 : i32
    %37 = arith.mulf %3, %36 : vector<8x128xf32>
    %38 = arith.addf %37, %6 : vector<8x128xf32>
    %39 = vector.extract_strided_slice %38 {offsets = [0, 0], sizes = [1, 128], strides = [1, 1]} : vector<8x128xf32> to vector<1x128xf32>
    %40 = vector.extract_strided_slice %38 {offsets = [1, 0], sizes = [1, 128], strides = [1, 1]} : vector<8x128xf32> to vector<1x128xf32>
    %41 = math.cos %40 : vector<1x128xf32>
    %42 = arith.mulf %39, %41 : vector<1x128xf32>
    %43 = math.sin %40 : vector<1x128xf32>
    %44 = arith.mulf %39, %43 : vector<1x128xf32>
    %45 = vector.extract_strided_slice %38 {offsets = [2, 0], sizes = [6, 128], strides = [1, 1]} : vector<8x128xf32> to vector<6x128xf32>
    %46 = tpu.concatenate %42, %44, %45 in 0 : vector<1x128xf32>, vector<1x128xf32>, vector<6x128xf32> -> vector<8x128xf32>
    %c0_5 = arith.constant 0 : index
    %c0_6 = arith.constant 0 : index
    %47 = vector.load %arg4[%c0_5, %c0_6] : memref<8x128xf32, #tpu.memory_space<vmem>>, vector<8x128xf32>
    tpu.vector_store %arg4[%c0_5, %c0_6], %46 {strides = array<i32>} : memref<8x128xf32, #tpu.memory_space<vmem>>, vector<8x128xf32>,
    return
  }
  func.func @transform_0(%arg0: i32) -> (i32, i32) {
    %c0_i32 = arith.constant 0 : i32
    %c0_i32_0 = arith.constant 0 : i32
    %c0_i32_1 = arith.constant 0 : i32
    return %c0_i32, %c0_i32_0 : i32, i32
  }
  func.func @transform_1(%arg0: i32) -> (i32, i32) {
    %c0_i32 = arith.constant 0 : i32
    %c0_i32_0 = arith.constant 0 : i32
    %c0_i32_1 = arith.constant 0 : i32
    return %c0_i32, %c0_i32_0 : i32, i32
  }
  func.func @transform_2(%arg0: i32) -> (i32, i32) {
    %c0_i32 = arith.constant 0 : i32
    %c0_i32_0 = arith.constant 0 : i32
    return %c0_i32, %arg0 : i32, i32
  }
  func.func @transform_3(%arg0: i32) -> (i32, i32) {
    %c0_i32 = arith.constant 0 : i32
    %c0_i32_0 = arith.constant 0 : i32
    return %c0_i32, %arg0 : i32, i32
  }
}

</mosaic_0001>

<bundles_post_ra>
// kernel: tpu_custom_call.1
= control target key start
LH: loop header
LB: loop body
LE: loop exit
PB: predicated region body
PF: predicated region fallthrough
CT: control target
= control target key end

     0   :  { %s419_s0 = inlined_call_operand.vmem [shape: f32[8,1], index: 0, kind: input, shape index: {}]   ;;  %s420_s1 = inlined_call_operand.vmem [shape: f32[8,1], index: 1, kind: input, shape index: {}]   ;;  %s421_s2 = inlined_call_operand.vmem [shape: f32[8,128], index: 2, kind: input, shape index: {}]   ;;  %s422_s3 = inlined_call_operand.hbm [shape: f32[8,128], index: 3, kind: output, shape index: {}]  }
   0x1   :  { %v16_v0 = vld [vmem:[%s419_s0] sm:$0xff] }
   0x2   :  { %8 = vsyncpa [#allocation3], 0  ;;  %v346_v1 = vmov 0   ;;  %v22_v2 = vld [vmem:[%s420_s1] sm:$0xff]  ;;  %v347_v48 = vmov 683565275  }
   0x3   :  { %317 = vset.pattern.permute.xlu0 %v346_v1  ;;  %v15_v4 = vld [vmem:[%s421_s2] sm:$0xff]  ;;  %v348_v50 = vmov 2475754826   ;;  %v349_v53 = vmov 2131351028   ;;  %s353_s0 = smov [#allocation2]  }
   0x4   :  { %19 = vperm.xlu0 %317, %v16_v0   ;;  %v350_v56 = vmov 2102212464   ;;  %v351_v59 = vmov 920167782   ;;  %v352_v62 = vmov 1326507024  }
   0x5   :  { %s289_s1 = sshll.u32 %s353_s0, 4  ;;  %s290_s1 = int_to_ptr.vmem [resolvable:$true] %s289_s1 }
   0x6   :  { %s322_s2 = scalar_lea.vmem %s290_s1, 128  ;;  %p327_p1 = scmp.lt.s32.totalorder %s290_s1, %s290_s1 }
   0x7   :  { %p323_p0 = scmp.ne.s32.totalorder %s290_s1, %s322_s2  ;;  %p328_p2 = scmp.lt.s32.totalorder %s322_s2, %s322_s2 }
   0x8   :  { %25 = vperm.xlu0 %317, %v22_v2  }
   0x9   :  { %p329_p3 = por %p328_p2, %p327_p1 }
   0xb   :  { %p330_p4 = pnand %p329_p3, %p323_p0 }
  0x83   :  { %v20_v3 = vpop.permute.xlu0 %19 }
  0x84   :  { %v28_v5 = vmul.f32 %v20_v3, %v15_v4 }
  0x87   :  { %v26_v6 = vpop.permute.xlu0 %25 }
  0x88   :  { %v29_v7 = vadd.f32 %v28_v5, %v26_v6 }
  0x8a   :  { %v30_v8 = vmul.f32 %v29_v7, %v20_v3 }
  0x8c   :  { %v31_v9 = vadd.f32 %v30_v8, %v26_v6 }
  0x8e   :  { %v32_v10 = vmul.f32 %v31_v9, %v20_v3 }
  0x90   :  { %v33_v11 = vadd.f32 %v32_v10, %v26_v6 }
  0x92   :  { %v34_v12 = vmul.f32 %v33_v11, %v20_v3 }
  0x94   :  { %v35_v13 = vadd.f32 %v34_v12, %v26_v6 }
  0x96   :  { %v36_v14 = vmul.f32 %v35_v13, %v20_v3 }
  0x98   :  { %v37_v15 = vadd.f32 %v36_v14, %v26_v6 }
  0x9a   :  { %v38_v16 = vmul.f32 %v37_v15, %v20_v3 }
  0x9c   :  { %v39_v17 = vadd.f32 %v38_v16, %v26_v6 }
  0x9e   :  { %v40_v18 = vmul.f32 %v39_v17, %v20_v3 }
  0xa0   :  { %v41_v19 = vadd.f32 %v40_v18, %v26_v6 }
  0xa2   :  { %v42_v20 = vmul.f32 %v41_v19, %v20_v3 }
  0xa4   :  { %v43_v21 = vadd.f32 %v42_v20, %v26_v6 }
  0xa6   :  { %v44_v22 = vmul.f32 %v43_v21, %v20_v3 }
  0xa8   :  { %v45_v23 = vadd.f32 %v44_v22, %v26_v6 }
  0xaa   :  { %v46_v24 = vmul.f32 %v45_v23, %v20_v3 }
  0xac   :  { %v47_v25 = vadd.f32 %v46_v24, %v26_v6 }
  0xae   :  { %v48_v26 = vmul.f32 %v47_v25, %v20_v3 }
  0xb0   :  { %v49_v27 = vadd.f32 %v48_v26, %v26_v6 }
  0xb2   :  { %v50_v28 = vmul.f32 %v49_v27, %v20_v3 }
  0xb4   :  { %v51_v29 = vadd.f32 %v50_v28, %v26_v6 }
  0xb6   :  { %v52_v30 = vmul.f32 %v51_v29, %v20_v3 }
  0xb8   :  { %v53_v31 = vadd.f32 %v52_v30, %v26_v6 }
  0xba   :  { %v54_v32 = vmul.f32 %v53_v31, %v20_v3 }
  0xbc   :  { %v55_v33 = vadd.f32 %v54_v32, %v26_v6 }
  0xbe   :  { %v56_v34 = vmul.f32 %v55_v33, %v20_v3 }
  0xc0   :  { %v57_v35 = vadd.f32 %v56_v34, %v26_v6 }
  0xc2   :  { %v58_v36 = vmul.f32 %v57_v35, %v20_v3 }
  0xc4   :  { %v383_v37 = vadd.f32 %v58_v36, %v26_v6 }
  0xc6   :  { %v63_v38 = vand.u32 2139095040, %v383_v37  ;;  %v60_v42 = vand.u32 2147483647, %v383_v37  ;;  %vm62_vm7 = vcmp.lt.s32.totalorder %v383_v37, 0  ;;  %vm152_vm15 = vweird.f32 %v383_v37 }
  0xc8   :  { %v64_v39 = vshrl.u32 %v63_v38, 23  ;;  %v67_v45 = vand.u32 8388607, %v60_v42  ;;  %vm61_vm8 = vcmp.le.f32.partialorder %v60_v42, 0.7853982 }
  0xca   :  { %v297_v40 = vadd.s32 4294967169, %v64_v39  ;;  %v68_v0 = vor.u32 8388608, %v67_v45 }
  0xcc   :  { %v70_v41 = vadd.s32 1, %v297_v40  ;;  %v108_v14 = vshll.u32 %v68_v0, 8 }
  0xce   :  { %vm71_vm0 = vcmp.gt.s32.totalorder %v70_v41, 0 }
  0xcf   :  { %v72_v43 = vsel %vm71_vm0, %v70_v41, 0  ;;  %vm278_vm0 = vcmask 1040384  }
  0xd0   :  { %v74_v44 = vand.u32 31, %v72_v43  ;;  %v73_v47 = vshrl.u32 %v72_v43, 5 }
  0xd2   :  { %v75_v46 = vsub.s32 32, %v74_v44  ;;  %v77_v49 = vshll.u32 %v347_v48, %v74_v44  ;;  %v80_v51 = vshll.u32 %v348_v50, %v74_v44  ;;  %v83_v55 = vshll.u32 %v349_v53, %v74_v44 }
  0xd3   :  { %v86_v58 = vshll.u32 %v350_v56, %v74_v44  ;;  %v89_v61 = vshll.u32 %v351_v59, %v74_v44  ;;  %vm92_vm1 = vcmp.lt.s32.totalorder %v73_v47, 1  ;;  %vm95_vm2 = vcmp.lt.s32.totalorder %v73_v47, 4 }
  0xd4   :  { %v78_v52 = vshrl.u32 %v348_v50, %v75_v46  ;;  %v81_v54 = vshrl.u32 %v349_v53, %v75_v46  ;;  %v84_v57 = vshrl.u32 %v350_v56, %v75_v46  ;;  %v87_v60 = vshrl.u32 %v351_v59, %v75_v46 }
  0xd5   :  { %v90_v63 = vshrl.u32 %v352_v62, %v75_v46  ;;  %v76_v9 = vshrl.u32 %v347_v48, %v75_v46  ;;  %vm94_vm3 = vcmp.lt.s32.totalorder %v73_v47, 3  ;;  %vm93_vm4 = vcmp.lt.s32.totalorder %v73_v47, 2 }
  0xd6   :  { %v79_v1 = vor.u32 %v78_v52, %v77_v49  ;;  %v82_v2 = vor.u32 %v81_v54, %v80_v51  ;;  %v85_v3 = vor.u32 %v84_v57, %v83_v55  ;;  %v88_v4 = vor.u32 %v87_v60, %v86_v58 }
  0xd7   :  { %v91_v5 = vor.u32 %v90_v63, %v89_v61 }
  0xd8   :  { %v97_v6 = vsel %vm95_vm2, %v85_v3, 2102212464  ;;  %v100_v7 = vsel %vm92_vm1, %v79_v1, %v82_v2  ;;  %v104_v8 = vsel %vm92_vm1, %v82_v2, %v85_v3  ;;  %v101_v10 = vsel %vm95_vm2, %v88_v4, 920167782 }
  0xd9   :  { %v105_v11 = vsel %vm95_vm2, %v91_v5, 1326507024  ;;  %v102_v12 = vsel %vm94_vm3, %v85_v3, %v101_v10  ;;  %v96_v15 = vsel %vm92_vm1, %v76_v9, %v79_v1  ;;  %v98_v16 = vsel %vm94_vm3, %v82_v2, %v97_v6 }
  0xda   :  { %v106_v13 = vsel %vm94_vm3, %v88_v4, %v105_v11  ;;  %v103_v17 = vsel %vm93_vm4, %v100_v7, %v102_v12  ;;  %v99_v23 = vsel %vm93_vm4, %v96_v15, %v98_v16  ;;  %vm280_vm1 = vcmask 1041408  }
  0xdb   :  { %v107_v18 = vsel %vm93_vm4, %v104_v8, %v106_v13  ;;  %v392_v21 = vmul.u32.u64.low %v108_v14, %v103_v17  ;;  %v393_v22 = vmul.u32.u64.high %v108_v14, %v103_v17, %v392_v21  ;;  %v115_v25 = vmul.u32 %v108_v14, %v99_v23 }
  0xdc   :  { %v389_v19 = vmul.u32.u64.low %v108_v14, %v107_v18  ;;  %v390_v20 = vmul.u32.u64.high %v108_v14, %v107_v18, %v389_v19 }
  0xdd   :  { %v118_v24 = vadd.s32 1, %v393_v22 }
  0xde   :  { %vm117_vm5 = vc.u32 %v390_v20, %v392_v21  ;;  %v116_v38 = vadd.s32 %v392_v21, %v390_v20 }
  0xdf   :  { %v119_v26 = vsel %vm117_vm5, %v118_v24, %v393_v22 }
  0xe0   :  { %v120_v27 = vadd.s32 %v119_v26, %v115_v25 }
  0xe2   :  { %v121_v28 = vadd.s32 536870912, %v120_v27 }
  0xe4   :  { %v122_v29 = vshrl.u32 %v121_v28, 30 }
  0xe6   :  { %v123_v30 = vshll.u32 %v122_v29, 30  ;;  %v146_v51 = vsub.s32 4, %v122_v29 }
  0xe8   :  { %v124_v31 = vsub.s32 %v120_v27, %v123_v30  ;;  %v147_v54 = vsel %vm62_vm7, %v146_v51, %v122_v29 }
  0xe9   :  { %v149_v56 = vsel %vm61_vm8, 0, %v147_v54 }
  0xea   :  { %v126_v32 = vsub.s32 0, %v124_v31  ;;  %v260_v57 = vadd.s32 3, %v149_v56  ;;  %v153_v58 = vand.u32 3, %v149_v56 }
  0xec   :  { %v298_v33 = vmin.u32 %v126_v32, %v124_v31  ;;  %v261_v59 = vand.u32 3, %v260_v57  ;;  %vm158_vm9 = vcmp.eq.s32.totalorder %v153_v58, 2  ;;  %vm155_vm11 = vcmp.eq.s32.totalorder %v153_v58, 0 }
  0xed   :  { %vm154_vm13 = vcmp.lt.s32.totalorder %v153_v58, 2 }
  0xee   :  { %v128_v34 = vclz %v298_v33  ;;  %vm266_vm10 = vcmp.eq.s32.totalorder %v261_v59, 2  ;;  %vm263_vm12 = vcmp.eq.s32.totalorder %v261_v59, 0  ;;  %vm262_vm14 = vcmp.lt.s32.totalorder %v261_v59, 2 }
  0xf0   :  { %v299_v35 = vadd.s32 4294967294, %v128_v34 }
  0xf2   :  { %vm300_vm6 = vcmp.lt.s32.totalorder %v299_v35, 0 }
  0xf3   :  { %v131_v36 = vsel %vm300_vm6, 0, %v299_v35 }
  0xf4   :  { %v132_v39 = vsub.s32 32, %v131_v36  ;;  %v136_v40 = vsub.s32 4294967266, %v131_v36  ;;  %v133_v41 = vshll.u32 %v124_v31, %v131_v36 }
  0xf6   :  { %v134_v43 = vshrl.u32 %v116_v38, %v132_v39  ;;  %v137_v44 = vadd.s32 127, %v136_v40 }
  0xf8   :  { %v135_v45 = vor.u32 %v134_v43, %v133_v41  ;;  %v138_v46 = vshll.u32 %v137_v44, 23 }
  0xfa   :  { %v139_v47 = vor.u32 4788187, %v138_v46  ;;  %v142_v49 = vcvt.s32.f32 %v135_v45 }
  0xfc   :  { %v140_v48 = vand.u32 2147483647, %v139_v47 }
  0xfe   :  { %v143_v50 = vmul.f32 %v142_v49, %v140_v48 }
 0x100   :  { %v144_v52 = vxor.u32 2147483648, %v143_v50 }
 0x102   :  { %v145_v53 = vsel %vm62_vm7, %v144_v52, %v143_v50 }
 0x103   :  { %v148_v55 = vsel %vm61_vm8, %v383_v37, %v145_v53 }
 0x104   :  { %318 = vcosq.f32 %v148_v55 }
 0x105   :  { %320 = vsinq.f32 %v148_v55 }
 0x10e   :  { %v319_v60 = vpop.eup %318 }
 0x10f   :  { %v321_v61 = vpop.eup %320  ;;  %v159_v62 = vxor.u32 2147483648, %v319_v60 }
 0x110   :  { %v156_v63 = vxor.u32 2147483648, %v321_v61 }
 0x111   :  { %v160_v0 = vsel %vm158_vm9, %v159_v62, %v321_v61  ;;  %v268_v42 = vsel %vm266_vm10, %v159_v62, %v321_v61 }
 0x112   :  { %v157_v1 = vsel %vm155_vm11, %v319_v60, %v156_v63  ;;  %v265_v2 = vsel %vm263_vm12, %v319_v60, %v156_v63 }
 0x113   :  { %v161_v3 = vsel %vm154_vm13, %v157_v1, %v160_v0  ;;  %v269_v4 = vsel %vm262_vm14, %v265_v2, %v268_v42 }
 0x114   :  { %v162_v5 = vsel %vm152_vm15, nan, %v161_v3  ;;  %v270_v6 = vsel %vm152_vm15, nan, %v269_v4 }
 0x115   :  { %v164_v7 = vrot.slane %v162_v5, 1  ;;  %v272_v8 = vrot.slane %v270_v6, 1 }
 0x117   :  { %v274_v9 = vmul.f32 %v272_v8, %v383_v37  ;;  %v166_v10 = vmul.f32 %v164_v7, %v383_v37 }
 0x119   :  { %v276_v11 = vrot.slane %v274_v9, 7 }
 0x11b   :  { %v279_v12 = vsel %vm278_vm0, %v166_v10, %v276_v11 }
 0x11c   :  { %v281_v13 = vsel %vm280_vm1, %v279_v12, %v383_v37 }
 0x11d   :  { %282 = vst [vmem:[#allocation2] sm:$0xff] %v281_v13 }
 0x11e   :  { %333 = shalt.err (!%p330_p4)
}
 0x11f   :  { %s334_s20 = scalar_lea.hbm %s422_s3, 128 }
 0x120   :  { %p335_p5 = scmp.ne.s32.totalorder %s422_s3, %s334_s20  ;;  %p338_p6 = scmp.lt.u32.totalorder %s334_s20, %s422_s3 }
 0x122   :  { %p340_p7 = pnand %p338_p6, %p335_p5 }
 0x124   :  { %343 = shalt.err (!%p340_p7)
}
 0x125   :  { %292 = dma.vmem_to_hbm [thread:$0]  %s290_s1, 128, %s422_s3, [#allocation3]  }
 0x126   :  { %344 = dma.done.wait [#allocation3], 128  }
 0x127   :  { %345 = vsyncadd [#allocation3], 4294967168 }
 0x128   :  { %296 = vsyncpa [#allocation3], 1 }

</bundles_post_ra>
